<compile_context>
chip_gen: v5e
topology: v5e:2x2
jax: 0.10.0
libtpu: 0.0.40
codegen_flags: <defaults>
</compile_context>

<pallas_src>
import numpy as np
import jax
import jax.numpy as jnp
from jax import lax
from jax.experimental import pallas as pl
from jax.experimental.pallas import tpu as pltpu


def _momentum_coefs(k):
    # FISTA momentum schedule (pure Python scalars, as in the reference).
    coefs = []
    t = 1.0
    for _ in range(k):
        t0 = t
        t = (1.0 + np.sqrt(1.0 + 4.0 * t * t)) / 2.0
        coefs.append(float((t0 - 1.0) / t))
    return coefs


def _make_fista_kernel(k, L, lmbda, n):
    theta = float(lmbda) / float(L)
    eps = 1e-30  # makes |u| == 0 give scale == 0 (matches reference behavior)

    def kernel(coef_ref, c_ref, gp_ref, x_ref):
        # coef_ref: (k,)     f32 momentum coefficients, SMEM (dynamic per-iter read)
        # c_ref   : (TB, 2N) packed constant term   c  = (1/L) * (A^H y), [cr | ci]
        # gp_ref  : (2N, 2N) packed Gram operator   Gp = I - (1/L) * A^H A
        # x_ref   : (TB, 2N) packed iterate [xr | xi]  (lane-dense output)
        c = c_ref[...]
        Gp = gp_ref[...]
        zeros = jnp.zeros(c.shape, jnp.float32)

        def body(i, carry):
            x, z_old = carry

            # u = x + (1/L) * A^H (y - A x)  ==  x @ Gp + c   (ONE MXU matmul)
            u = jnp.dot(x, Gp, preferred_element_type=jnp.float32) + c

            # Complex soft threshold on the packed [ur | ui] layout:
            #   |u|^2 per complex element, broadcast to both halves via an XLU
            #   lane roll by N (pairs lane j with lane j+N mod 2N).
            usq = u * u
            magsq = usq + pltpu.roll(usq, shift=n, axis=1)
            #   scale = max(0, 1 - theta / |u|)  -- one EUP rsqrt, no sqrt/divide.
            scale = jnp.maximum(1.0 - theta * lax.rsqrt(magsq + eps), 0.0)
            z = scale * u

            # Momentum step: x = z + ((t0-1)/t) * (z - z_old)
            mom = coef_ref[i]
            x_new = z + mom * (z - z_old)
            return (x_new, z)

        # fori_loop (not Python unroll): FISTA iterations are serially
        # dependent, so unrolling buys no ILP and only inflates live ranges.
        x_final, _ = lax.fori_loop(0, k, body, (zeros, zeros))
        x_ref[...] = x_final

    return kernel


class FISTA:
    """JAX/Pallas port of the PyTorch FISTA module.

    forward_op / backward_op are realized as a fixed complex matrix A (built
    deterministically in-script):  y: (B, m, 2),  x: (B, n, 2).
    """

    def __init__(self, m, n, k, A_real, A_imag, L, lmbda, batch_tile=256):
        self.m = int(m)
        self.n = int(n)
        self.k = int(k)
        self.lmbda = float(lmbda)
        self.L = 1  # the reference __init__ overrides L with 1
        # 256 rows fill the v6e/v7x MXU; >=128 is the useful floor on v5e.
        self.batch_tile = int(batch_tile)

        Ar = jnp.asarray(A_real, jnp.float32)   # (m, n)
        Ai = jnp.asarray(A_imag, jnp.float32)   # (m, n)
        ArT, AiT = Ar.T, Ai.T

        # [xr|xi] (B,2N) @ W_fwd (2N,2M) == packed forward op [fr|fi]
        W_fwd = jnp.concatenate(
            [jnp.concatenate([ArT, AiT], axis=1),
             jnp.concatenate([-AiT, ArT], axis=1)], axis=0)      # (2n, 2m)
        # [ar|ai] (B,2M) @ W_bwd (2M,2N) == packed adjoint op [br|bi]
        W_bwd = jnp.concatenate(
            [jnp.concatenate([Ar, -Ai], axis=1),
             jnp.concatenate([Ai, Ar], axis=1)], axis=0)          # (2m, 2n)

        inv_L = 1.0 / float(self.L)
        n2 = 2 * self.n
        # Gram fusion (one matmul per FISTA iteration inside the kernel).
        self.Gp = (jnp.eye(n2, dtype=jnp.float32)
                   - inv_L * (W_fwd @ W_bwd))                     # (2n, 2n)
        self.W_bwd = W_bwd
        self.inv_L = inv_L
        self._coefs = jnp.asarray(_momentum_coefs(self.k), jnp.float32)
        self._kernel = _make_fista_kernel(self.k, self.L, self.lmbda, self.n)
        # TODO(synk): for large A, cast Gp/c to bf16 (f32 accumulate) and K-tile
        # the Gram matmul; kept f32 here to stay within rtol=1e-3/atol=1e-4 of
        # the f32 reference (soft-threshold cutoff is sensitive to operand
        # quantization).
        # TODO(synk): for large Gp on v7x (64 MiB VMEM), add
        # pipeline_mode=pl.Buffered(1) on the constant-index Gp BlockSpec and
        # set vmem_limit_bytes explicitly with headroom.

    def __call__(self, y, info=None):
        # y: (B, m, 2) float32
        y = jnp.asarray(y, jnp.float32)
        B = y.shape[0]
        n2 = 2 * self.n

        # Pack measurements and fold them through the adjoint ONCE in the
        # wrapper:  c = (1/L) * (A^H y)  packed as [cr | ci].  The kernel never
        # sees y or A directly -> fewer inputs, less DMA on the critical path.
        y_packed = jnp.concatenate([y[:, :, 0], y[:, :, 1]], axis=1)   # (B, 2m)
        c_packed = self.inv_L * (y_packed @ self.W_bwd)                # (B, 2n)

        # Pad batch to a multiple of 8 sublanes and of the batch tile.
        B8 = max(8, -(-B // 8) * 8)
        TB = min(B8, self.batch_tile)           # multiple of 8
        Bp = -(-B8 // TB) * TB
        if Bp != B:
            c_packed = jnp.pad(c_packed, ((0, Bp - B), (0, 0)))

        grid_steps = Bp // TB
        flops = self.k * (2 * Bp * n2 * n2 + 8 * Bp * n2)
        transcendentals = self.k * Bp * n2
        bytes_accessed = 4 * (2 * Bp * n2 + grid_steps * n2 * n2 + self.k)

        x_packed = pl.pallas_call(
            self._kernel,
            out_shape=jax.ShapeDtypeStruct((Bp, n2), jnp.float32),
            grid=(grid_steps,),
            in_specs=[
                pl.BlockSpec(memory_space=pltpu.MemorySpace.SMEM),  # momentum coefs
                pl.BlockSpec((TB, n2), lambda b: (b, 0)),           # per-tile c
                pl.BlockSpec((n2, n2), lambda b: (0, 0)),           # Gp stays resident
            ],
            out_specs=pl.BlockSpec((TB, n2), lambda b: (b, 0)),
            compiler_params=pltpu.CompilerParams(
                dimension_semantics=("parallel",)),                  # batch tiles -> both TCs
            cost_estimate=pl.CostEstimate(
                flops=flops, transcendentals=transcendentals,
                bytes_accessed=bytes_accessed),
        )(self._coefs, c_packed, self.Gp)

        x = jnp.stack([x_packed[:B, :self.n], x_packed[:B, self.n:]], axis=-1)
        return (x, 0, 0)


# ------------------------- pure-JAX reference ------------------------------
def _fista_ref(y, A_real, A_imag, k, L, lmbda):
    yr, yi = y[:, :, 0], y[:, :, 1]
    B = y.shape[0]
    n = A_real.shape[1]
    xr = jnp.zeros((B, n), jnp.float32)
    xi = jnp.zeros((B, n), jnp.float32)
    zr, zi = xr, xi
    t = 1.0
    for _ in range(k):
        zro, zio = zr, zi
        fr = xr @ A_real.T - xi @ A_imag.T
        fi = xr @ A_imag.T + xi @ A_real.T
        ar_, ai_ = yr - fr, yi - fi
        br = ar_ @ A_real + ai_ @ A_imag
        bi = ai_ @ A_real - ar_ @ A_imag
        ur, ui = xr + br / L, xi + bi / L
        mag = jnp.sqrt(ur * ur + ui * ui)
        r = jnp.maximum(mag - lmbda / L, 0.0)
        scale = r / jnp.maximum(mag, 1e-30)
        zr, zi = scale * ur, scale * ui
        t0 = t
        t = (1.0 + np.sqrt(1.0 + 4.0 * t ** 2)) / 2.0
        c = (t0 - 1.0) / t
        xr = zr + c * (zr - zro)
        xi = zi + c * (zi - zio)
    return jnp.stack([xr, xi], axis=-1)


if __name__ == "__main__":
    # Small, deterministic problem: B=2 batches, m=32 measurements,
    # n=64 unknowns (complex), k=8 FISTA iterations.
    B, m, n, k = 2, 32, 64, 8
    lmbda = 0.1

    key = jax.random.PRNGKey(0)
    k1, k2, k3 = jax.random.split(key, 3)
    A_real = jax.random.normal(k1, (m, n), jnp.float32) / np.sqrt(m)
    A_imag = jax.random.normal(k2, (m, n), jnp.float32) / np.sqrt(m)
    y = jax.random.normal(k3, (B, m, 2), jnp.float32)

    model = FISTA(m, n, k, A_real, A_imag, L=1, lmbda=lmbda)
    x, _, _ = model(y, info=None)
    x = jax.block_until_ready(x)

    x_ref = jax.block_until_ready(_fista_ref(y, A_real, A_imag, k, 1.0, lmbda))
    np.testing.assert_allclose(np.asarray(x), np.asarray(x_ref),
                               rtol=1e-3, atol=1e-4)

    print("KERNEL_OK")
</pallas_src>

<mosaic_0001>
module attributes {stable_mosaic.version = 11 : i64} {
  func.func @kernel(%arg0: i32, %arg1: memref<8xf32, #tpu.memory_space<smem>>, %arg2: memref<8x128xf32, #tpu.memory_space<vmem>>, %arg3: memref<128x128xf32, #tpu.memory_space<vmem>>, %arg4: memref<8x128xf32, #tpu.memory_space<vmem>>) attributes {dimension_semantics = [#tpu.dimension_semantics<parallel>], iteration_bounds = array<i64: 1>, scalar_prefetch = 0 : i64, scratch_operands = 0 : i64, tpu.core_type = #tpu.core_type<tc>, window_params = [{transform_indices = @transform_0, window_bounds = array<i64: 8>}, {transform_indices = @transform_1, window_bounds = array<i64: 8, 128>}, {pipeline_mode = #tpu.pipeline_mode<synchronous>, transform_indices = @transform_2, window_bounds = array<i64: 128, 128>}, {transform_indices = @transform_3, window_bounds = array<i64: 8, 128>}]} {
    %c0 = arith.constant 0 : index
    %c0_0 = arith.constant 0 : index
    %0 = vector.load %arg2[%c0, %c0_0] : memref<8x128xf32, #tpu.memory_space<vmem>>, vector<8x128xf32>
    %c0_1 = arith.constant 0 : index
    %c0_2 = arith.constant 0 : index
    %1 = vector.load %arg3[%c0_1, %c0_2] : memref<128x128xf32, #tpu.memory_space<vmem>>, vector<128x128xf32>
    %cst = arith.constant 0.000000e+00 : f32
    %2 = vector.broadcast %cst : f32 to vector<8x128xf32>
    %c0_i32 = arith.constant 0 : i32
    %c8_i32 = arith.constant 8 : i32
    %3 = arith.addi %c0_i32, %c8_i32 : i32
    %c1_i32 = arith.constant 1 : i32
    %4:2 = scf.for %arg5 = %c0_i32 to %3 step %c1_i32 iter_args(%arg6 = %2, %arg7 = %2) -> (vector<8x128xf32>, vector<8x128xf32>)  : i32 {
      %cst_6 = arith.constant dense<0.000000e+00> : vector<8x128xf32>
      %6 = tpu.matmul %arg6, %1, %cst_6 {dimension_numbers = #tpu.dot_dimension_numbers<[1], [0], [0], [1], [0, 0, 1, 1], [], []>} : vector<8x128xf32>, vector<128x128xf32>, vector<8x128xf32> -> vector<8x128xf32>
      %7 = arith.addf %6, %0 : vector<8x128xf32>
      %8 = arith.mulf %7, %7 : vector<8x128xf32>
      %c64_i32 = arith.constant 64 : i32
      %9 = tpu.dynamic_rotate %8 by %c64_i32 dim 1 : vector<8x128xf32>, i32 -> vector<8x128xf32>
      %10 = arith.addf %8, %9 : vector<8x128xf32>
      %cst_7 = arith.constant 1.000000e-30 : f32
      %11 = vector.broadcast %cst_7 : f32 to vector<8x128xf32>
      %12 = arith.addf %10, %11 : vector<8x128xf32>
      %13 = math.rsqrt %12 : vector<8x128xf32>
      %cst_8 = arith.constant 1.000000e-01 : f32
      %14 = vector.broadcast %cst_8 : f32 to vector<8x128xf32>
      %15 = arith.mulf %14, %13 : vector<8x128xf32>
      %cst_9 = arith.constant 1.000000e+00 : f32
      %16 = vector.broadcast %cst_9 : f32 to vector<8x128xf32>
      %17 = arith.subf %16, %15 : vector<8x128xf32>
      %cst_10 = arith.constant 0.000000e+00 : f32
      %18 = vector.broadcast %cst_10 : f32 to vector<8x128xf32>
      %19 = arith.maximumf %17, %18 : vector<8x128xf32>
      %20 = arith.mulf %19, %7 : vector<8x128xf32>
      %21 = arith.index_cast %arg5 : i32 to index
      %22 = memref.load %arg1[%21] : memref<8xf32, #tpu.memory_space<smem>>
      %23 = arith.subf %20, %arg7 : vector<8x128xf32>
      %24 = vector.broadcast %22 : f32 to vector<8x128xf32>
      %25 = arith.mulf %24, %23 : vector<8x128xf32>
      %26 = arith.addf %20, %25 : vector<8x128xf32>
      scf.yield %26, %20 : vector<8x128xf32>, vector<8x128xf32>
    }
    %c8_i32_3 = arith.constant 8 : i32
    %c0_4 = arith.constant 0 : index
    %c0_5 = arith.constant 0 : index
    %5 = vector.load %arg4[%c0_4, %c0_5] : memref<8x128xf32, #tpu.memory_space<vmem>>, vector<8x128xf32>
    tpu.vector_store %arg4[%c0_4, %c0_5], %4#0 {strides = array<i32>} : memref<8x128xf32, #tpu.memory_space<vmem>>, vector<8x128xf32>,
    return
  }
  func.func @transform_0(%arg0: i32) -> i32 {
    %c0_i32 = arith.constant 0 : i32
    %c0_i32_0 = arith.constant 0 : i32
    return %c0_i32 : i32
  }
  func.func @transform_1(%arg0: i32) -> (i32, i32) {
    %c0_i32 = arith.constant 0 : i32
    %c0_i32_0 = arith.constant 0 : i32
    return %arg0, %c0_i32 : i32, i32
  }
  func.func @transform_2(%arg0: i32) -> (i32, i32) {
    %c0_i32 = arith.constant 0 : i32
    %c0_i32_0 = arith.constant 0 : i32
    %c0_i32_1 = arith.constant 0 : i32
    return %c0_i32, %c0_i32_0 : i32, i32
  }
  func.func @transform_3(%arg0: i32) -> (i32, i32) {
    %c0_i32 = arith.constant 0 : i32
    %c0_i32_0 = arith.constant 0 : i32
    return %arg0, %c0_i32 : i32, i32
  }
}

</mosaic_0001>

<bundles_post_ra>
// kernel: tpu_custom_call.1
= control target key start
LH: loop header
LB: loop body
LE: loop exit
PB: predicated region body
PF: predicated region fallthrough
CT: control target
= control target key end

     0   :  { %8 = vsyncpa [#allocation5], 0  ;;  %s397_s0 = inlined_call_operand.hbm [shape: f32[8], index: 0, kind: input, shape index: {}]   ;;  %s398_s1 = inlined_call_operand.hbm [shape: f32[8,128], index: 1, kind: input, shape index: {}]   ;;  %s399_s2 = inlined_call_operand.hbm [shape: f32[128,128], index: 2, kind: input, shape index: {}]   ;;  %s400_s3 = inlined_call_operand.hbm [shape: f32[8,128], index: 3, kind: output, shape index: {}]  }
   0x1   :  { %9 = vsyncpa [#allocation3], 0 }
   0x2   :  { %10 = vsyncpa [#allocation8], 0 }
   0x3   :  { %11 = vsyncpa [#allocation4], 0  ;;  %s17_s14 = sshll.u32 %s397_s0, 4  ;;  %s26_s17 = sshll.u32 %s398_s1, 4  ;;  %s18_s14 = int_to_ptr.hbm [resolvable:$true] %s17_s14  ;;  %s27_s17 = int_to_ptr.hbm [resolvable:$true] %s26_s17 }
   0x4   :  { %s307_s18 = smov [#allocation2]   ;;  %s308_s19 = smov [#allocation6]  }
   0x5   :  { %20 = dma.hbm_to_smem %s18_s14, 16, %s307_s18, [#allocation5]  }
   0x6   :  { %s28_s20 = sshll.u32 %s308_s19, 4  ;;  %s36_s23 = sshll.u32 %s399_s2, 4  ;;  %s29_s20 = int_to_ptr.vmem [resolvable:$true] %s28_s20  ;;  %s37_s23 = int_to_ptr.hbm [resolvable:$true] %s36_s23 }
   0x7   :  { %31 = dma.hbm_to_vmem [thread:$0]  %s27_s17, 128, %s29_s20, [#allocation3]  }
   0x8   :  { %s309_s24 = smov [#allocation7]   ;;  %s310_s0 = smov 128  }
   0x9   :  { %s38_s25 = sshll.u32 %s309_s24, 4  ;;  %s311_s26 = smov 8   ;;  %s39_s25 = int_to_ptr.vmem [resolvable:$true] %s38_s25 }
   0xa   :  { %44 = dma.hbm_to_vmem [thread:$0]  %s37_s23, 2048, %s39_s25, [#allocation8], %s310_s0, %s310_s0, %s311_s26  }
   0xb   :  { %287 = dma.done.wait [#allocation5], 16  }
   0xc   :  { %288 = vsyncadd [#allocation5], 4294967280 }
   0xd   :  { %289 = dma.done.wait [#allocation3], 128  }
   0xe   :  { %290 = vsyncadd [#allocation3], 4294967168 }
   0xf   :  { %291 = dma.done.wait [#allocation8], 2048  }
  0x10   :  { %292 = vsyncadd [#allocation8], 4294965248 }
  0x11   :  { %57 = sfence }
  0x12   :  { %v343_v0 = vld [vmem:[#allocation6] sm:$0xff]  ;;  %v345_v1 = vld [vmem:[#allocation7] sm:$0xff]  ;;  %v347_v2 = vld [vmem:[#allocation7 + $0x8] sm:$0xff]  ;;  %v295_v17 = vmov 0.0   ;;  %v299_v18 = vmov 0.0   ;;  %s371_s1 = smov 0  }
  0x13   :  { %v349_v3 = vld [vmem:[#allocation7 + $0x10] sm:$0xff]  ;;  %v351_v4 = vld [vmem:[#allocation7 + $0x18] sm:$0xff]  ;;  %v353_v5 = vld [vmem:[#allocation7 + $0x20] sm:$0xff] }
  0x14   :  { %v355_v6 = vld [vmem:[#allocation7 + $0x28] sm:$0xff]  ;;  %v357_v7 = vld [vmem:[#allocation7 + $0x30] sm:$0xff]  ;;  %v359_v8 = vld [vmem:[#allocation7 + $0x38] sm:$0xff] }
  0x15   :  { %v361_v9 = vld [vmem:[#allocation7 + $0x40] sm:$0xff]  ;;  %v363_v10 = vld [vmem:[#allocation7 + $0x48] sm:$0xff]  ;;  %v365_v11 = vld [vmem:[#allocation7 + $0x50] sm:$0xff] }
  0x16   :  { %v367_v12 = vld [vmem:[#allocation7 + $0x58] sm:$0xff]  ;;  %v369_v13 = vld [vmem:[#allocation7 + $0x60] sm:$0xff]  ;;  %v72_v14 = vld [vmem:[#allocation7 + $0x68] sm:$0xff] }
  0x17   :  { %v73_v15 = vld [vmem:[#allocation7 + $0x70] sm:$0xff]  ;;  %v74_v16 = vld [vmem:[#allocation7 + $0x78] sm:$0xff] }
  0x18 LB: > { %83 = vmatpush.msra.mxu0 %v74_v16  ;;  %s312_s2 = smov 64   ;;  %s122_s27 = sld [smem:[#allocation2 + %s305_s1]]  ;;  %s305_s1 = sphi %s371_s1, %s80_s1   ;;  %v301_v18 = vphi %v299_v18, %v300_v18   ;;  %v297_v17 = vphi %v295_v17, %v296_v17  }
  0x19   : > { %s80_s1 = sadd.s32 1, %s305_s1  }
  0x1a   : > { %84 = vmatpush.msra.mxu0 %v73_v15  ;;  %p77_p0 = scmp.ge.s32.totalorder %s80_s1, 8  }
  0x1b   :  { %s135_s30 = sshll.u32 (%p77_p0), %s400_s3, 4  ;;  %s313_s4 = smov (%p77_p0), [#allocation9]   ;;  %s136_s30 = int_to_ptr.hbm [resolvable:$true] %s135_s30 }
  0x1c   : > { %85 = vmatpush.msra.mxu0 %v72_v14  ;;  %s133_s5 = sshll.u32 (%p77_p0), %s313_s4, 4  ;;  %s134_s5 = int_to_ptr.vmem [resolvable:$true] %s133_s5 }
  0x1e   : > { %86 = vmatpush.msra.mxu0 %v369_v13  ;;  %v124_v36 = vstv %s122_s27 }
  0x20   : > { %87 = vmatpush.msra.mxu0 %v367_v12 }
  0x22   : > { %88 = vmatpush.msra.mxu0 %v365_v11 }
  0x24   : > { %89 = vmatpush.msra.mxu0 %v363_v10 }
  0x26   : > { %90 = vmatpush.msra.mxu0 %v361_v9 }
  0x28   : > { %91 = vmatpush.msra.mxu0 %v359_v8 }
  0x2a   : > { %92 = vmatpush.msra.mxu0 %v357_v7 }
  0x2c   : > { %93 = vmatpush.msra.mxu0 %v355_v6 }
  0x2e   : > { %94 = vmatpush.msra.mxu0 %v353_v5 }
  0x30   : > { %95 = vmatpush.msra.mxu0 %v351_v4 }
  0x32   : > { %96 = vmatpush.msra.mxu0 %v349_v3 }
  0x34   : > { %97 = vmatpush.msra.mxu0 %v347_v2 }
  0x36   : > { %98 = vmatpush.msra.mxu0 %v345_v1 }
  0x37   : > { %99 = vmatmul.f32.vlgmr.msra.gmra.mxu0 %v301_v18 }
  0xb4   : > { %v100_v19 = vpop.f32.mrf.mxu0 }
  0xb5   : > { %v101_v20 = vadd.f32 %v100_v19, %v343_v0 }
  0xb7   : > { %v103_v21 = vmul.f32 %v101_v20, %v101_v20 }
  0xb9   : > { %104 = vrot.lane.b32.xlu0 %v103_v21, %s312_s2 }
 0x12b   : > { %v105_v22 = vpop.permute.xlu0 %104 }
 0x12c   : > { %v106_v23 = vadd.f32 %v105_v22, %v103_v21 }
 0x12e   : > { %v107_v24 = vadd.f32 1e-30, %v106_v23 }
 0x130   : > { %189 = vrsqrt.f32 %v107_v24  ;;  %vm114_vm1 = vweird.f32 %v107_v24 }
 0x136   : > { %v190_v25 = vpop.eup %189 }
 0x137   : > { %v109_v26 = vmul.f32 %v190_v25, %v107_v24  ;;  %vm115_vm0 = vweird.f32 %v190_v25 }
 0x138   : > { %vm116_vm2 = vmor %vm114_vm1, %vm115_vm0 }
 0x139   : > { %v110_v27 = vmul.f32 %v190_v25, %v109_v26 }
 0x13b   : > { %v111_v28 = vmul.f32 0.5, %v110_v27 }
 0x13d   : > { %v112_v29 = vsub.f32 1.5, %v111_v28 }
 0x13f   : > { %v113_v30 = vmul.f32 %v190_v25, %v112_v29 }
 0x141   : > { %v117_v31 = vsel %vm116_vm2, %v190_v25, %v113_v30 }
 0x142   : > { %v118_v32 = vmul.f32 0.1, %v117_v31 }
 0x144   : > { %v119_v33 = vsub.f32 1.0, %v118_v32 }
 0x146   : > { %v120_v34 = vmax.f32 %v119_v33, 0.0 }
 0x148   : > { %v121_v35 = vmul.f32 %v120_v34, %v101_v20  }
 0x14a   : > { %v123_v37 = vsub.f32 %v121_v35, %v297_v17  ;;  %v296_v17 = vmov %v121_v35  }
 0x14c   : > { %v125_v38 = vmul.f32 %v124_v36, %v123_v37  ;;  %79 = sbr.rel (!%p77_p0) target bundleno = 24 (0x18), region = 51 }
 0x14e   : > { %v126_v39 = vadd.f32 %v125_v38, %v121_v35  }
 0x150   : > { %v300_v18 = vmov %v126_v39   ;;  %127 = vst [vmem:[#allocation9] sm:$0xff] (%p77_p0), %v126_v39 }
 0x151   :  { %138 = dma.vmem_to_hbm [thread:$0]  %s134_s5, 128, %s136_s30, [#allocation4]  }
 0x152   :  { %293 = dma.done.wait [#allocation4], 128  }
 0x153   :  { %294 = vsyncadd [#allocation4], 4294967168 }
 0x154   :  { %143 = vsyncpa [#allocation3], 1 }
 0x155   :  { %144 = vsyncpa [#allocation8], 1 }
 0x156   :  { %145 = vsyncpa [#allocation4], 1 }
 0x157   :  { %146 = vsyncpa [#allocation5], 1 }

</bundles_post_ra>
